<compile_context>
chip_gen: v7x
topology: tpu7x:2x2x1
jax: 0.10.0
libtpu: 0.0.40
codegen_flags: <defaults>
</compile_context>

<pallas_src>
import functools
import math

import jax
import jax.numpy as jnp
from jax.experimental import pallas as pl
from jax.experimental.pallas import tpu as pltpu

_BN_EPS = 1e-5
_LANE = 128


def _mlp_kernel(n_hidden, in0, x_ref, w_ref, v_ref, o_ref):
    """Fused MLP forward on one (mb, in) tile.

    x_ref : (mb, in0)                 bf16 activations
    w_ref : (n_layers, 128, 128)      bf16 weight slab (lane/row zero-padded)
    v_ref : (2*n_hidden + 1, 128)     f32  [gamma_i; beta_i]*n_hidden + bias
    o_ref : (mb, 128)                 f32  lane-dense padded output
    """
    h = x_ref[...]
    if h.dtype != jnp.bfloat16:
        h = h.astype(jnp.bfloat16)

    k_full = w_ref.shape[1]  # 128

    for li in range(n_hidden):
        k = in0 if li == 0 else k_full
        w = w_ref[li] if k == k_full else w_ref[li, 0:k, :]     # (k, 128) bf16
        # Linear (bias omitted: cancelled exactly by BN mean subtraction).
        z = jnp.dot(h, w, preferred_element_type=jnp.float32)   # (mb, 128) f32

        gamma = v_ref[2 * li: 2 * li + 1, :]                    # (1, 128) f32
        beta = v_ref[2 * li + 1: 2 * li + 2, :]                 # (1, 128) f32

        # BatchNorm1d, train mode: biased batch variance, two-pass form.
        mean = jnp.mean(z, axis=0, keepdims=True)
        d = z - mean
        var = jnp.mean(d * d, axis=0, keepdims=True)
        scale = gamma * jax.lax.rsqrt(var + _BN_EPS)            # (1, 128)
        # Normalize + affine + ReLU; padded lanes stay exactly 0 (gamma=beta=0).
        h = jnp.maximum(d * scale + beta, 0.0).astype(jnp.bfloat16)

    # Final Linear (no BN / activation), lane-dense padded output.
    k = in0 if n_hidden == 0 else k_full
    w = w_ref[n_hidden] if k == k_full else w_ref[n_hidden, 0:k, :]
    b = v_ref[2 * n_hidden: 2 * n_hidden + 1, :]                # (1, 128) f32
    out = jnp.dot(h, w, preferred_element_type=jnp.float32) + b
    o_ref[...] = out.astype(o_ref.dtype)


def init_mlp_params(key, size_list):
    """PyTorch-layout f32 params.

    Hidden layer i -> (W (out,in), b (out,), gamma (out,), beta (out,)).
    Final layer    -> (W (out,in), b (out,)).
    """
    n_hidden = len(size_list) - 2
    layers = []
    for i in range(n_hidden + 1):
        fan_in, fan_out = size_list[i], size_list[i + 1]
        key, kw, kb = jax.random.split(key, 3)
        bound = 1.0 / math.sqrt(fan_in)
        w = jax.random.uniform(kw, (fan_out, fan_in), jnp.float32, -bound, bound)
        b = jax.random.uniform(kb, (fan_out,), jnp.float32, -bound, bound)
        if i < n_hidden:
            layers.append((w, b,
                           jnp.ones((fan_out,), jnp.float32),    # BN gamma
                           jnp.zeros((fan_out,), jnp.float32)))  # BN beta
        else:
            layers.append((w, b))
    return layers


def pack_params_for_kernel(layers, size_list):
    """Pack all params into 2 lane-padded slabs (done once at init time).

    Returns:
      w_slab: (n_layers, 128, 128) bf16 -- w_i.T zero-padded in rows & cols.
      v_slab: (2*n_hidden + 1, 128) f32 -- gamma_i/beta_i rows + final bias,
              padded columns are exactly zero (safe BN/ReLU invariant).
    Hidden-layer biases are intentionally dropped (cancel under train-mode BN).
    """
    n_hidden = len(size_list) - 2
    n_layers = n_hidden + 1
    assert all(s <= _LANE for s in size_list), (
        "this packing assumes every feature width <= 128; widen the slab to "
        "multiples of 128 per dim for bigger layers")
    w_slab = jnp.zeros((n_layers, _LANE, _LANE), jnp.bfloat16)
    v_slab = jnp.zeros((2 * n_hidden + 1, _LANE), jnp.float32)
    for i, layer in enumerate(layers):
        w = layer[0]                      # (out, in) f32
        out_f, in_f = w.shape
        w_slab = w_slab.at[i, :in_f, :out_f].set(w.T.astype(jnp.bfloat16))
        if i < n_hidden:
            _, _b, gamma, beta = layer    # hidden bias dropped
            v_slab = v_slab.at[2 * i, :out_f].set(gamma)
            v_slab = v_slab.at[2 * i + 1, :out_f].set(beta)
        else:
            _, b = layer
            v_slab = v_slab.at[2 * n_hidden, :out_f].set(b)
    return w_slab, v_slab


def _check_no_dropout(size_list):
    n_hidden = len(size_list) - 2
    # The PyTorch module inserts train-mode Dropout at hidden indices 3 / 7.
    assert n_hidden <= 3, (
        "size_list implies train-mode Dropout layers (i==3/i==7) which this "
        "kernel does not implement")
    # TODO(synk): pltpu.prng_seed / prng_random_bits Bernoulli masking if a
    # size_list with >= 4 hidden layers (Dropout at i==3/i==7) is ever used.
    return n_hidden


def _cost(total_rows, size_list, x, w_slab, v_slab):
    flops = 2 * total_rows * sum(size_list[i] * size_list[i + 1]
                                 for i in range(len(size_list) - 1))
    transcendentals = sum(size_list[1:-1])  # one rsqrt per BN feature per mb
    bytes_accessed = (int(x.size) * x.dtype.itemsize
                      + int(w_slab.size) * w_slab.dtype.itemsize
                      + int(v_slab.size) * v_slab.dtype.itemsize
                      + total_rows * _LANE * 4)
    return pl.CostEstimate(flops=flops, transcendentals=transcendentals,
                           bytes_accessed=bytes_accessed)


def mlp_forward(x, w_slab, v_slab, size_list, *, unpad=True):
    """Single forward pass; x: (batch, in_features). Gridless (tiny shapes)."""
    n_hidden = _check_no_dropout(size_list)
    batch, in_f = x.shape
    assert in_f == size_list[0]
    out_features = size_list[-1]
    if x.dtype != jnp.bfloat16:
        x = x.astype(jnp.bfloat16)   # halves the only per-call-varying DMA

    kernel = functools.partial(_mlp_kernel, n_hidden, in_f)
    out_padded = pl.pallas_call(
        kernel,
        out_shape=jax.ShapeDtypeStruct((batch, _LANE), jnp.float32),
        cost_estimate=_cost(batch, size_list, x, w_slab, v_slab),
        # Gridless: 3 whole-array VMEM operands (x + 2 packed slabs).
    )(x, w_slab, v_slab)
    # unpad=False lets downstream consume the lane-dense (batch, 128) array
    # and skip this extra tiny XLA slice kernel.
    return out_padded[:, :out_features] if unpad else out_padded


def mlp_forward_microbatched(x, w_slab, v_slab, size_list, *, unpad=True):
    """Many independent forwards; x: (num_mb, mb, in_features).

    Grids over micro-batches (each micro-batch = one independent forward with
    its own BN batch statistics).  Weight/vector slabs use a constant
    index_map so they stay resident in VMEM across grid steps; the grid axis
    is marked "parallel" so Mosaic can shard it across v7x's two TensorCores.
    """
    n_hidden = _check_no_dropout(size_list)
    num_mb, mb, in_f = x.shape
    assert in_f == size_list[0]
    assert mb % 8 == 0, "micro-batch size must be sublane-aligned (multiple of 8)"
    out_features = size_list[-1]
    if x.dtype != jnp.bfloat16:
        x = x.astype(jnp.bfloat16)

    kernel = functools.partial(_mlp_kernel, n_hidden, in_f)
    grid_spec = pltpu.PrefetchScalarGridSpec(
        num_scalar_prefetch=0,
        grid=(num_mb,),
        in_specs=[
            pl.BlockSpec((None, mb, in_f), lambda i: (i, 0, 0)),
            pl.BlockSpec(w_slab.shape, lambda i: (0, 0, 0)),   # resident
            pl.BlockSpec(v_slab.shape, lambda i: (0, 0)),      # resident
        ],
        out_specs=pl.BlockSpec((None, mb, _LANE), lambda i: (i, 0, 0)),
    )
    out_padded = pl.pallas_call(
        kernel,
        out_shape=jax.ShapeDtypeStruct((num_mb, mb, _LANE), jnp.float32),
        grid_spec=grid_spec,
        compiler_params=pltpu.CompilerParams(
            dimension_semantics=("parallel",)),
        cost_estimate=_cost(num_mb * mb, size_list, x, w_slab, v_slab),
    )(x, w_slab, v_slab)
    return out_padded[..., :out_features] if unpad else out_padded


def mlp_reference(x, layers, mimic_kernel_precision=True):
    """Pure-JAX forward with full PyTorch train-mode semantics.

    Keeps the hidden-layer biases and the textbook two-pass biased variance,
    so it independently validates the kernel's algebraic shortcuts (bias
    cancellation, fused BN scale/shift, lane padding).  With
    mimic_kernel_precision the matmul inputs are rounded to bf16 like the
    kernel so the comparison tolerance can stay tight.
    """
    cast = (lambda a: a.astype(jnp.bfloat16)) if mimic_kernel_precision else (lambda a: a)
    h = x.astype(jnp.float32)
    for (w, b, gamma, beta) in layers[:-1]:
        z = jnp.dot(cast(h), cast(w.T), preferred_element_type=jnp.float32) + b[None, :]
        mean = jnp.mean(z, axis=0, keepdims=True)
        var = jnp.mean((z - mean) ** 2, axis=0, keepdims=True)
        z = (z - mean) / jnp.sqrt(var + _BN_EPS) * gamma[None, :] + beta[None, :]
        h = jnp.maximum(z, 0.0)
    w, b = layers[-1]
    return jnp.dot(cast(h), cast(w.T), preferred_element_type=jnp.float32) + b[None, :]


if __name__ == "__main__":
    size_list = [32, 64, 48, 16]   # 2 hidden (Linear+BN+ReLU) layers + final Linear
    batch = 8

    key = jax.random.PRNGKey(0)
    kx, kp, kx2 = jax.random.split(key, 3)
    x = jax.random.normal(kx, (batch, size_list[0]), jnp.float32)
    layers = init_mlp_params(kp, size_list)
    w_slab, v_slab = pack_params_for_kernel(layers, size_list)

    # Single-forward (module semantics) path.
    out = jax.block_until_ready(mlp_forward(x, w_slab, v_slab, size_list))
    ref = mlp_reference(x, layers, mimic_kernel_precision=True)
    assert out.shape == (batch, size_list[-1])
    assert jnp.allclose(out, ref, atol=1e-2, rtol=1e-2), (
        float(jnp.max(jnp.abs(out - ref))))

    # Micro-batched / gridded path (weights resident, BN stats per micro-batch).
    num_mb = 2
    x_mb = jax.random.normal(kx2, (num_mb, batch, size_list[0]), jnp.float32)
    out_mb = jax.block_until_ready(
        mlp_forward_microbatched(x_mb, w_slab, v_slab, size_list))
    ref_mb = jnp.stack([mlp_reference(x_mb[i], layers) for i in range(num_mb)])
    assert out_mb.shape == (num_mb, batch, size_list[-1])
    assert jnp.allclose(out_mb, ref_mb, atol=1e-2, rtol=1e-2), (
        float(jnp.max(jnp.abs(out_mb - ref_mb))))

    print("KERNEL_OK")
</pallas_src>

<mosaic_0001>
module attributes {stable_mosaic.version = 11 : i64} {
  func.func @_mlp_kernel(%arg0: memref<8x32xbf16, #tpu.memory_space<vmem>>, %arg1: memref<3x128x128xbf16, #tpu.memory_space<vmem>>, %arg2: memref<5x128xf32, #tpu.memory_space<vmem>>, %arg3: memref<8x128xf32, #tpu.memory_space<vmem>>) attributes {dimension_semantics = [], scalar_prefetch = 0 : i64, scratch_operands = 0 : i64, tpu.core_type = #tpu.core_type<tc>} {
    %c0 = arith.constant 0 : index
    %c0_0 = arith.constant 0 : index
    %0 = vector.load %arg0[%c0, %c0_0] : memref<8x32xbf16, #tpu.memory_space<vmem>>, vector<8x32xbf16>
    %c0_1 = arith.constant 0 : index
    %c0_2 = arith.constant 0 : index
    %c0_3 = arith.constant 0 : index
    %1 = vector.load %arg1[%c0_1, %c0_2, %c0_3] : memref<3x128x128xbf16, #tpu.memory_space<vmem>>, vector<1x32x128xbf16>
    %2 = vector.shape_cast %1 : vector<1x32x128xbf16> to vector<32x128xbf16>
    %cst = arith.constant dense<0.000000e+00> : vector<8x128xf32>
    %3 = tpu.matmul %0, %2, %cst {dimension_numbers = #tpu.dot_dimension_numbers<[1], [0], [0], [1], [0, 0, 1, 1], [], []>} : vector<8x32xbf16>, vector<32x128xbf16>, vector<8x128xf32> -> vector<8x128xf32>
    %c0_4 = arith.constant 0 : index
    %c0_5 = arith.constant 0 : index
    %4 = vector.load %arg2[%c0_4, %c0_5] : memref<5x128xf32, #tpu.memory_space<vmem>>, vector<1x128xf32>
    %c1 = arith.constant 1 : index
    %c0_6 = arith.constant 0 : index
    %5 = vector.load %arg2[%c1, %c0_6] : memref<5x128xf32, #tpu.memory_space<vmem>>, vector<1x128xf32>
    %cst_7 = arith.constant dense<0.000000e+00> : vector<128xf32>
    %6 = vector.multi_reduction <add>, %3, %cst_7 [0] : vector<8x128xf32> to vector<128xf32>
    %7 = vector.shape_cast %6 : vector<128xf32> to vector<1x128xf32>
    %cst_8 = arith.constant 8.000000e+00 : f32
    %8 = vector.broadcast %cst_8 : f32 to vector<1x128xf32>
    %9 = arith.divf %7, %8 : vector<1x128xf32>
    %10 = vector.broadcast %9 : vector<1x128xf32> to vector<8x128xf32>
    %11 = arith.subf %3, %10 : vector<8x128xf32>
    %12 = arith.mulf %11, %11 : vector<8x128xf32>
    %cst_9 = arith.constant dense<0.000000e+00> : vector<128xf32>
    %13 = vector.multi_reduction <add>, %12, %cst_9 [0] : vector<8x128xf32> to vector<128xf32>
    %14 = vector.shape_cast %13 : vector<128xf32> to vector<1x128xf32>
    %cst_10 = arith.constant 8.000000e+00 : f32
    %15 = vector.broadcast %cst_10 : f32 to vector<1x128xf32>
    %16 = arith.divf %14, %15 : vector<1x128xf32>
    %cst_11 = arith.constant 9.99999974E-6 : f32
    %17 = vector.broadcast %cst_11 : f32 to vector<1x128xf32>
    %18 = arith.addf %16, %17 : vector<1x128xf32>
    %19 = math.rsqrt %18 : vector<1x128xf32>
    %20 = arith.mulf %4, %19 : vector<1x128xf32>
    %21 = vector.broadcast %20 : vector<1x128xf32> to vector<8x128xf32>
    %22 = arith.mulf %11, %21 : vector<8x128xf32>
    %23 = vector.broadcast %5 : vector<1x128xf32> to vector<8x128xf32>
    %24 = arith.addf %22, %23 : vector<8x128xf32>
    %cst_12 = arith.constant 0.000000e+00 : f32
    %25 = vector.broadcast %cst_12 : f32 to vector<8x128xf32>
    %26 = arith.maximumf %24, %25 : vector<8x128xf32>
    %27 = arith.truncf %26 : vector<8x128xf32> to vector<8x128xbf16>
    %c1_13 = arith.constant 1 : index
    %c0_14 = arith.constant 0 : index
    %c0_15 = arith.constant 0 : index
    %28 = vector.load %arg1[%c1_13, %c0_14, %c0_15] : memref<3x128x128xbf16, #tpu.memory_space<vmem>>, vector<1x128x128xbf16>
    %29 = vector.shape_cast %28 : vector<1x128x128xbf16> to vector<128x128xbf16>
    %cst_16 = arith.constant dense<0.000000e+00> : vector<8x128xf32>
    %30 = tpu.matmul %27, %29, %cst_16 {dimension_numbers = #tpu.dot_dimension_numbers<[1], [0], [0], [1], [0, 0, 1, 1], [], []>} : vector<8x128xbf16>, vector<128x128xbf16>, vector<8x128xf32> -> vector<8x128xf32>
    %c2 = arith.constant 2 : index
    %c0_17 = arith.constant 0 : index
    %31 = vector.load %arg2[%c2, %c0_17] : memref<5x128xf32, #tpu.memory_space<vmem>>, vector<1x128xf32>
    %c3 = arith.constant 3 : index
    %c0_18 = arith.constant 0 : index
    %32 = vector.load %arg2[%c3, %c0_18] : memref<5x128xf32, #tpu.memory_space<vmem>>, vector<1x128xf32>
    %cst_19 = arith.constant dense<0.000000e+00> : vector<128xf32>
    %33 = vector.multi_reduction <add>, %30, %cst_19 [0] : vector<8x128xf32> to vector<128xf32>
    %34 = vector.shape_cast %33 : vector<128xf32> to vector<1x128xf32>
    %cst_20 = arith.constant 8.000000e+00 : f32
    %35 = vector.broadcast %cst_20 : f32 to vector<1x128xf32>
    %36 = arith.divf %34, %35 : vector<1x128xf32>
    %37 = vector.broadcast %36 : vector<1x128xf32> to vector<8x128xf32>
    %38 = arith.subf %30, %37 : vector<8x128xf32>
    %39 = arith.mulf %38, %38 : vector<8x128xf32>
    %cst_21 = arith.constant dense<0.000000e+00> : vector<128xf32>
    %40 = vector.multi_reduction <add>, %39, %cst_21 [0] : vector<8x128xf32> to vector<128xf32>
    %41 = vector.shape_cast %40 : vector<128xf32> to vector<1x128xf32>
    %cst_22 = arith.constant 8.000000e+00 : f32
    %42 = vector.broadcast %cst_22 : f32 to vector<1x128xf32>
    %43 = arith.divf %41, %42 : vector<1x128xf32>
    %cst_23 = arith.constant 9.99999974E-6 : f32
    %44 = vector.broadcast %cst_23 : f32 to vector<1x128xf32>
    %45 = arith.addf %43, %44 : vector<1x128xf32>
    %46 = math.rsqrt %45 : vector<1x128xf32>
    %47 = arith.mulf %31, %46 : vector<1x128xf32>
    %48 = vector.broadcast %47 : vector<1x128xf32> to vector<8x128xf32>
    %49 = arith.mulf %38, %48 : vector<8x128xf32>
    %50 = vector.broadcast %32 : vector<1x128xf32> to vector<8x128xf32>
    %51 = arith.addf %49, %50 : vector<8x128xf32>
    %cst_24 = arith.constant 0.000000e+00 : f32
    %52 = vector.broadcast %cst_24 : f32 to vector<8x128xf32>
    %53 = arith.maximumf %51, %52 : vector<8x128xf32>
    %54 = arith.truncf %53 : vector<8x128xf32> to vector<8x128xbf16>
    %c2_25 = arith.constant 2 : index
    %c0_26 = arith.constant 0 : index
    %c0_27 = arith.constant 0 : index
    %55 = vector.load %arg1[%c2_25, %c0_26, %c0_27] : memref<3x128x128xbf16, #tpu.memory_space<vmem>>, vector<1x128x128xbf16>
    %56 = vector.shape_cast %55 : vector<1x128x128xbf16> to vector<128x128xbf16>
    %c4 = arith.constant 4 : index
    %c0_28 = arith.constant 0 : index
    %57 = vector.load %arg2[%c4, %c0_28] : memref<5x128xf32, #tpu.memory_space<vmem>>, vector<1x128xf32>
    %cst_29 = arith.constant dense<0.000000e+00> : vector<8x128xf32>
    %58 = tpu.matmul %54, %56, %cst_29 {dimension_numbers = #tpu.dot_dimension_numbers<[1], [0], [0], [1], [0, 0, 1, 1], [], []>} : vector<8x128xbf16>, vector<128x128xbf16>, vector<8x128xf32> -> vector<8x128xf32>
    %59 = vector.broadcast %57 : vector<1x128xf32> to vector<8x128xf32>
    %60 = arith.addf %58, %59 : vector<8x128xf32>
    %c0_30 = arith.constant 0 : index
    %c0_31 = arith.constant 0 : index
    %61 = vector.load %arg3[%c0_30, %c0_31] : memref<8x128xf32, #tpu.memory_space<vmem>>, vector<8x128xf32>
    tpu.vector_store %arg3[%c0_30, %c0_31], %60 {strides = array<i32>} : memref<8x128xf32, #tpu.memory_space<vmem>>, vector<8x128xf32>,
    return
  }
}

</mosaic_0001>

<bundles_post_ra>
// kernel: tpu_custom_call.1
= control target key start
LH: loop header
LB: loop body
LE: loop exit
PB: predicated region body
PF: predicated region fallthrough
CT: control target
= control target key end

     0   :  { %8 = vsyncpa [#allocation3], 0  ;;  %s725_s0 = inlined_call_operand.hbm [shape: bf16[8,32], index: 0, kind: input, shape index: {}]   ;;  %s726_s1 = inlined_call_operand.hbm [shape: bf16[3,128,128], index: 1, kind: input, shape index: {}]   ;;  %s727_s2 = inlined_call_operand.hbm [shape: f32[5,128], index: 2, kind: input, shape index: {}]   ;;  %s728_s3 = inlined_call_operand.hbm [shape: f32[8,128], index: 3, kind: output, shape index: {}]  }
   0x1   :  { %9 = vsyncpa [#allocation6], 0 }
   0x2   :  { %10 = vsyncpa [#allocation4], 0  ;;  %s628_s12 = smov [#allocation5]   ;;  %s534_s16 = scalar_lea.hbm %s726_s1, 3072 }
   0x3   :  { %s26_s13 = sshll.u32 %s628_s12, 4  ;;  %p535_p0 = scmp.ne.s32.totalorder %s726_s1, %s534_s16  ;;  %s27_s13 = int_to_ptr.vmem [resolvable:$true] %s26_s13 }
   0x4   :  { %p538_p1 = scmp.lt.u32.totalorder %s534_s16, %s726_s1 }
   0x6   :  { %p540_p2 = pnand %p538_p1, %p535_p0 }
   0x8   :  { %543 = shalt.err (!%p540_p2)
}
   0x9   :  { %s544_s21 = scalar_lea.vmem %s27_s13, 3072  ;;  %p549_p4 = scmp.lt.s32.totalorder %s27_s13, %s27_s13 }
   0xa   :  { %p545_p3 = scmp.ne.s32.totalorder %s27_s13, %s544_s21  ;;  %p550_p5 = scmp.lt.s32.totalorder %s544_s21, %s544_s21 }
   0xc   :  { %p551_p6 = por %p550_p5, %p549_p4 }
   0xe   :  { %p552_p7 = pnand %p551_p6, %p545_p3 }
  0x10   :  { %555 = shalt.err (!%p552_p7)
}
  0x11   :  { %s629_s22 = smov 64   ;;  %s630_s23 = smov 4  }
  0x12   :  { %32 = dma.hbm_to_vmem [thread:$0]  %s726_s1, 3072, %s27_s13, [#allocation6], %s629_s22, %s629_s22, %s630_s23  }
  0x13   :  { %s631_s26 = smov [#allocation2]   ;;  %s632_s28 = smov [#allocation7]  }
  0x14   :  { %s17_s27 = sshll.u32 %s631_s26, 4  ;;  %s39_s29 = sshll.u32 %s632_s28, 4  ;;  %s18_s27 = int_to_ptr.vmem [resolvable:$true] %s17_s27  ;;  %s40_s29 = int_to_ptr.vmem [resolvable:$true] %s39_s29 }
  0x15   :  { %s556_s5 = scalar_lea.hbm %s725_s0, 64 }
  0x16   :  { %p557_p8 = scmp.ne.s32.totalorder %s725_s0, %s556_s5  ;;  %p560_p9 = scmp.lt.u32.totalorder %s556_s5, %s725_s0 }
  0x18   :  { %p562_p10 = pnand %p560_p9, %p557_p8 }
  0x1a   :  { %565 = shalt.err (!%p562_p10)
}
  0x1b   :  { %s566_s1 = scalar_lea.vmem %s18_s27, 64  ;;  %p571_p12 = scmp.lt.s32.totalorder %s18_s27, %s18_s27 }
  0x1c   :  { %p567_p11 = scmp.ne.s32.totalorder %s18_s27, %s566_s1  ;;  %p572_p13 = scmp.lt.s32.totalorder %s566_s1, %s566_s1 }
  0x1e   :  { %p573_p0 = por %p572_p13, %p571_p12 }
  0x20   :  { %p574_p1 = pnand %p573_p0, %p567_p11 }
  0x22   :  { %577 = shalt.err (!%p574_p1)
}
  0x23   :  { %20 = dma.hbm_to_vmem [thread:$0]  %s725_s0, 64, %s18_s27, [#allocation3]  }
  0x24   :  { %s578_s14 = scalar_lea.hbm %s727_s2, 128 }
  0x25   :  { %p579_p2 = scmp.ne.s32.totalorder %s727_s2, %s578_s14  ;;  %p582_p3 = scmp.lt.u32.totalorder %s578_s14, %s727_s2 }
  0x27   :  { %p584_p4 = pnand %p582_p3, %p579_p2 }
  0x29   :  { %587 = shalt.err (!%p584_p4)
}
  0x2a   :  { %s588_s19 = scalar_lea.vmem %s40_s29, 128  ;;  %p593_p6 = scmp.lt.s32.totalorder %s40_s29, %s40_s29 }
  0x2b   :  { %p589_p5 = scmp.ne.s32.totalorder %s40_s29, %s588_s19  ;;  %p594_p7 = scmp.lt.s32.totalorder %s588_s19, %s588_s19 }
  0x2d   :  { %p595_p8 = por %p594_p7, %p593_p6 }
  0x2f   :  { %p596_p9 = pnand %p595_p8, %p589_p5 }
  0x31   :  { %599 = shalt.err (!%p596_p9)
}
  0x32   :  { %42 = dma.hbm_to_vmem [thread:$0]  %s727_s2, 128, %s40_s29, [#allocation6]  }
  0x33   :  { %622 = dma.done.wait [#allocation3], 64  }
  0x34   :  { %623 = vsyncadd [#allocation3], 4294967232 }
  0x35   :  { %624 = dma.done.wait [#allocation6], 3200  }
  0x36   :  { %625 = vsyncadd [#allocation6], 4294964096  ;;  %v633_v0 = vmov 0.0   ;;  %vm634_vm0 = vmmov 0   ;;  %v512_v1 = vld [vmem:[#allocation5] sm:$0xff]   ;;  %v513_v2 = vld [vmem:[#allocation5 + $0x8] sm:$0xff]   ;;  %v136_v33 = vlaneseq }
  0x37   :  { %456 = vmatprep.subr.bf16.mxu0 %v633_v0  ;;  %460 = vmatprep.mubr.msk.bf16.mxu0 %vm634_vm0, %v633_v0  ;;  %vm70_vm1 = vcmask 261120   ;;  %v53_v3 = vld [vmem:[#allocation2] sm:$0xf]  ;;  %v514_v4 = vld [vmem:[#allocation5 + $0x40] sm:$0xff]   ;;  %v515_v5 = vld [vmem:[#allocation5 + $0x48] sm:$0xff]   ;;  %s635_s2 = smov [#allocation8]  }
  0x38   :  { %464 = vmatprep.subr.bf16.mxu1 %v633_v0  ;;  %480 = vmatprep.mubr.msk.bf16.mxu1 %vm634_vm0, %v633_v0  ;;  %v516_v6 = vld [vmem:[#allocation5 + $0x50] sm:$0xff]   ;;  %v517_v7 = vld [vmem:[#allocation5 + $0x58] sm:$0xff]   ;;  %v518_v8 = vld [vmem:[#allocation5 + $0x60] sm:$0xff]   ;;  %v137_v34 = vshrl.u32 %v136_v33, 7  ;;  %s403_s21 = sshll.u32 %s635_s2, 4  ;;  %s404_s21 = int_to_ptr.vmem [resolvable:$true] %s403_s21 }
  0x39   :  { %457 = vmatpush3.bf16.msra.mxu0 %v512_v1  ;;  %465 = vmatpush3.bf16.msra.mxu1 %v514_v4  ;;  %v519_v9 = vld [vmem:[#allocation5 + $0x68] sm:$0xff]   ;;  %v520_v10 = vld [vmem:[#allocation5 + $0x70] sm:$0xff]   ;;  %v521_v11 = vld [vmem:[#allocation5 + $0x78] sm:$0xff]   ;;  %s600_s22 = scalar_lea.vmem %s404_s21, 128  ;;  %p605_p11 = scmp.lt.s32.totalorder %s404_s21, %s404_s21 }
  0x3a   :  { %458 = vmatprep.subr.bf16.mxu0 %v633_v0  ;;  %466 = vmatprep.subr.bf16.mxu1 %v633_v0  ;;  %v114_v35 = vld [vmem:[#allocation7] sm:$0x1]  ;;  %v138_v36 = vsub.s32 0, %v137_v34  ;;  %v416_v40 = vld [vmem:[#allocation7 + $0x1] ss:$0 sm:$0xff]  ;;  %v523_v46 = vld [vmem:[#allocation5 + $0x88] sm:$0xff]   ;;  %p601_p10 = scmp.ne.s32.totalorder %s404_s21, %s600_s22  ;;  %p606_p12 = scmp.lt.s32.totalorder %s600_s22, %s600_s22 }
  0x3b   :  { %v522_v45 = vld [vmem:[#allocation5 + $0x80] sm:$0xff]   ;;  %v524_v47 = vld [vmem:[#allocation5 + $0x90] sm:$0xff]   ;;  %v525_v48 = vld [vmem:[#allocation5 + $0x98] sm:$0xff]  }
  0x3c   :  { %v526_v49 = vld [vmem:[#allocation5 + $0xa0] sm:$0xff]   ;;  %v527_v50 = vld [vmem:[#allocation5 + $0xa8] sm:$0xff]   ;;  %v528_v51 = vld [vmem:[#allocation5 + $0xb0] sm:$0xff]   ;;  %p607_p13 = por %p606_p12, %p605_p11 }
  0x3d   :  { %459 = vmatpush3.bf16.msra.mxu0 %v513_v2  ;;  %467 = vmatpush3.bf16.msra.mxu1 %v515_v5  ;;  %v529_v52 = vld [vmem:[#allocation5 + $0xb8] sm:$0xff]  }
  0x3e   :  { %484 = vmatprep.subr.bf16.mxu0 %v633_v0  ;;  %468 = vmatprep.subr.bf16.mxu1 %v633_v0  ;;  %p608_p0 = pnand %p607_p13, %p601_p10 }
  0x40   :  { %461 = vmatmul.mubr.msk.bf16.vlgmr.msra.gmra.mrb[0].mxu0 %vm70_vm1, %v53_v3 }
  0x41   :  { %500 = vmatprep.mubr.msk.bf16.mxu0 %vm634_vm0, %v633_v0  ;;  %469 = vmatpush3.bf16.msra.mxu1 %v516_v6 }
  0x42   :  { %470 = vmatprep.subr.bf16.mxu1 %v633_v0  ;;  %485 = vmatpush3.bf16.msra.mxu0 %v522_v45 }
  0x43   :  { %486 = vmatprep.subr.bf16.mxu0 %v633_v0 }
  0x45   :  { %471 = vmatpush3.bf16.msra.mxu1 %v517_v7 }
  0x46   :  { %472 = vmatprep.subr.bf16.mxu1 %v633_v0  ;;  %487 = vmatpush3.bf16.msra.mxu0 %v523_v46 }
  0x47   :  { %488 = vmatprep.subr.bf16.mxu0 %v633_v0 }
  0x49   :  { %473 = vmatpush3.bf16.msra.mxu1 %v518_v8 }
  0x4a   :  { %474 = vmatprep.subr.bf16.mxu1 %v633_v0  ;;  %489 = vmatpush3.bf16.msra.mxu0 %v524_v47 }
  0x4b   :  { %490 = vmatprep.subr.bf16.mxu0 %v633_v0 }
  0x4d   :  { %475 = vmatpush3.bf16.msra.mxu1 %v519_v9 }
  0x4e   :  { %476 = vmatprep.subr.bf16.mxu1 %v633_v0  ;;  %491 = vmatpush3.bf16.msra.mxu0 %v525_v48 }
  0x4f   :  { %492 = vmatprep.subr.bf16.mxu0 %v633_v0 }
  0x51   :  { %477 = vmatpush3.bf16.msra.mxu1 %v520_v10  ;;  %v253_v10 = vld [vmem:[#allocation7 + $0x2] sm:$0x1] }
  0x52   :  { %478 = vmatprep.subr.bf16.mxu1 %v633_v0  ;;  %493 = vmatpush3.bf16.msra.mxu0 %v526_v49 }
  0x53   :  { %494 = vmatprep.subr.bf16.mxu0 %v633_v0 }
  0x55   :  { %479 = vmatpush3.bf16.msra.mxu1 %v521_v11 }
  0x56   :  { %495 = vmatpush3.bf16.msra.mxu0 %v527_v50 }
  0x57   :  { %496 = vmatprep.subr.bf16.mxu0 %v633_v0 }
  0x5a   :  { %497 = vmatpush3.bf16.msra.mxu0 %v528_v51 }
  0x5b   :  { %498 = vmatprep.subr.bf16.mxu0 %v633_v0 }
  0x5e   :  { %499 = vmatpush3.bf16.msra.mxu0 %v529_v52 }
 0x113   :  { %v108_v12 = vpop.f32.mrb[0].mxu0 }
 0x114   :  { %v116_v13 = vrot.slane %v108_v12, 4  ;;  %v462_v14 = vpop.f32.mrb[1].mxu0 }
 0x115   :  { %v111_v15 = vpop.f32.mrb[2].mxu0  ;;  %v425_v14 = vld [vmem:[#allocation7 + $0x3] ss:$0 sm:$0xff] }
 0x116   :  { %v117_v16 = vadd.f32 %v116_v13, %v108_v12  ;;  %v463_v17 = vpop.f32.mrb[3].mxu0 }
 0x118   :  { %v118_v18 = vrot.slane %v117_v16, 2 }
 0x11a   :  { %v119_v19 = vadd.f32 %v118_v18, %v117_v16 }
 0x11c   :  { %v120_v20 = vrot.slane %v119_v19, 1 }
 0x11e   :  { %v121_v21 = vadd.f32 %v120_v20, %v119_v19  ;;  %v426_v19 = vld [vmem:[#allocation7 + $0x4] ss:$0 sm:$0xff] }
 0x120   :  { %v123_v22 = vmul.f32 0.125, %v121_v21 }
 0x122   :  { %v124_v23 = vsub.f32 %v108_v12, %v123_v22 }
 0x124   :  { %v125_v24 = vmul.f32 %v124_v23, %v124_v23 }
 0x126   :  { %v126_v25 = vrot.slane %v125_v24, 4 }
 0x128   :  { %v127_v26 = vadd.f32 %v126_v25, %v125_v24 }
 0x12a   :  { %v128_v27 = vrot.slane %v127_v26, 2 }
 0x12c   :  { %v129_v28 = vadd.f32 %v128_v27, %v127_v26 }
 0x12e   :  { %v130_v29 = vrot.slane %v129_v28, 1 }
 0x130   :  { %v131_v30 = vadd.f32 %v130_v29, %v129_v28 }
 0x132   :  { %v132_v31 = vmul.f32 0.125, %v131_v30 }
 0x134   :  { %v133_v32 = vadd.f32 1e-05, %v132_v31 }
 0x136   :  { %530 = vrsqrt.f32 %v133_v32 }
 0x140   :  { %v531_v37 = vpop.eup %530 }
 0x141   :  { %v135_v38 = vmul.f32 %v531_v37, %v114_v35 }
 0x143   :  { %v139_v39 = vrot.slane %v135_v38, %v138_v36 }
 0x145   :  { %v140_v41 = vmul.f32 %v139_v39, %v124_v23 }
 0x147   :  { %v145_v42 = vadd.f32 %v416_v40, %v140_v41 }
 0x149   :  { %v146_v43 = vmax.f32 %v145_v42, 0.0 }
 0x14b   :  { %v147_v44 = vpack.c.bf16 %v146_v43, %v146_v43 }
 0x14d   :  { %481 = vmatmul.mubr.bf16.vlgmr.msra.gmra.mrb[0].mxu1 %v147_v44 }
 0x220   :  { %v247_v53 = vpop.f32.mrb[0].mxu1 }
 0x221   :  { %v255_v54 = vrot.slane %v247_v53, 4  ;;  %v482_v55 = vpop.f32.mrb[1].mxu1 }
 0x222   :  { %v250_v56 = vpop.f32.mrb[2].mxu1 }
 0x223   :  { %v256_v57 = vadd.f32 %v255_v54, %v247_v53  ;;  %v483_v58 = vpop.f32.mrb[3].mxu1 }
 0x225   :  { %v257_v59 = vrot.slane %v256_v57, 2 }
 0x227   :  { %v258_v60 = vadd.f32 %v257_v59, %v256_v57 }
 0x229   :  { %v259_v61 = vrot.slane %v258_v60, 1 }
 0x22b   :  { %v260_v62 = vadd.f32 %v259_v61, %v258_v60 }
 0x22d   :  { %v261_v63 = vmul.f32 0.125, %v260_v62 }
 0x22f   :  { %v262_v1 = vsub.f32 %v247_v53, %v261_v63 }
 0x231   :  { %v263_v2 = vmul.f32 %v262_v1, %v262_v1 }
 0x233   :  { %v264_v3 = vrot.slane %v263_v2, 4 }
 0x235   :  { %v265_v4 = vadd.f32 %v264_v3, %v263_v2 }
 0x237   :  { %v266_v5 = vrot.slane %v265_v4, 2 }
 0x239   :  { %v267_v6 = vadd.f32 %v266_v5, %v265_v4 }
 0x23b   :  { %v268_v0 = vrot.slane %v267_v6, 1 }
 0x23d   :  { %v269_v7 = vadd.f32 %v268_v0, %v267_v6 }
 0x23f   :  { %v270_v8 = vmul.f32 0.125, %v269_v7 }
 0x241   :  { %v271_v9 = vadd.f32 1e-05, %v270_v8 }
 0x243   :  { %532 = vrsqrt.f32 %v271_v9 }
 0x24d   :  { %v533_v11 = vpop.eup %532 }
 0x24e   :  { %v273_v12 = vmul.f32 %v533_v11, %v253_v10 }
 0x250   :  { %v277_v13 = vrot.slane %v273_v12, %v138_v36 }
 0x252   :  { %v278_v15 = vmul.f32 %v277_v13, %v262_v1 }
 0x254   :  { %v283_v16 = vadd.f32 %v425_v14, %v278_v15 }
 0x256   :  { %v284_v17 = vmax.f32 %v283_v16, 0.0 }
 0x258   :  { %v285_v18 = vpack.c.bf16 %v284_v17, %v284_v17 }
 0x25a   :  { %501 = vmatmul.mubr.bf16.vlgmr.msra.gmra.mrb[4].mxu0 %v285_v18 }
 0x32d   :  { %v390_v20 = vpop.f32.mrb[4].mxu0 }
 0x32e   :  { %v391_v21 = vadd.f32 %v426_v19, %v390_v20  ;;  %v502_v22 = vpop.f32.mrb[5].mxu0 }
 0x32f   :  { %v393_v23 = vpop.f32.mrb[6].mxu0 }
 0x330   :  { %396 = vst [vmem:[#allocation8] sm:$0xff] %v391_v21  ;;  %v503_v24 = vpop.f32.mrb[7].mxu0 }
 0x331   :  { %611 = shalt.err (!%p608_p0)
}
 0x332   :  { %s612_s25 = scalar_lea.hbm %s728_s3, 128 }
 0x333   :  { %p613_p1 = scmp.ne.s32.totalorder %s728_s3, %s612_s25  ;;  %p616_p2 = scmp.lt.u32.totalorder %s612_s25, %s728_s3 }
 0x335   :  { %p618_p3 = pnand %p616_p2, %p613_p1 }
 0x337   :  { %621 = shalt.err (!%p618_p3)
}
 0x338   :  { %406 = dma.vmem_to_hbm [thread:$0]  %s404_s21, 128, %s728_s3, [#allocation4]  }
 0x339   :  { %626 = dma.done.wait [#allocation4], 128  }
 0x33a   :  { %627 = vsyncadd [#allocation4], 4294967168 }
 0x33b   :  { %410 = vsyncpa [#allocation3], 1 }
 0x33c   :  { %411 = vsyncpa [#allocation6], 1 }
 0x33d   :  { %412 = vsyncpa [#allocation4], 1 }

</bundles_post_ra>
